<compile_context>
chip_gen: v6e
topology: v6e:2x2x1
jax: 0.10.0
libtpu: 0.0.40
codegen_flags: <defaults>
</compile_context>

<pallas_src>
import jax
import jax.numpy as jnp
from jax.experimental import pallas as pl
from jax.experimental.pallas import tpu as pltpu


def _implicit_a_kernel(bias_ref, x_ref, o_ref):
    # bias_ref: (tile_rows, 1) -- broadcast across lanes by the VPU
    # x_ref / o_ref: (tile_rows, tile_hw)
    o_ref[...] = x_ref[...] + bias_ref[...]


def _implicit_a_kernel_f32(bias_ref, x_ref, o_ref):
    # Low-precision storage (int8 / fp8): do the add in f32, cast on store.
    acc = x_ref[...].astype(jnp.float32) + bias_ref[...].astype(jnp.float32)
    o_ref[...] = acc.astype(o_ref.dtype)


def _round_up(v, m):
    return ((v + m - 1) // m) * m


def _block_budget():
    """(target_block_bytes, vmem_limit_bytes) chosen per TPU generation."""
    kind = ""
    try:
        kind = jax.devices()[0].device_kind.lower()
    except Exception:
        pass
    if "v5" in kind or "v6" in kind:
        # 128 MiB physical VMEM: big blocks amortize the ~0.35us/step overhead.
        return 8 << 20, 64 * 1024 * 1024
    # v7x (64 MiB physical VMEM) or unknown: stay conservative.
    return 4 << 20, 48 * 1024 * 1024


def implicit_a(x, implicit, *, use_pallas=None, donate_x=False):
    """x: (N, C, H, W), implicit: (1, C, 1, 1). Returns implicit + x (broadcast add)."""
    N, C, H, W = x.shape
    rows, hw = N * C, H * W
    dtype = x.dtype
    dbytes = jnp.dtype(dtype).itemsize

    # Tiny tensors: pallas_call overhead dominates a pure broadcast-add; let XLA fuse it.
    if use_pallas is None:
        use_pallas = rows * hw * dbytes >= (1 << 20)
    if not use_pallas:
        return implicit.astype(dtype) + x

    # Sublane packing for the dtype (f32: 8, bf16: 16, int8/fp8: 32).
    sub = {4: 8, 2: 16, 1: 32}.get(dbytes, 8)
    low_precision = dbytes <= 1
    bias_dtype = jnp.float32 if low_precision else dtype
    kernel = _implicit_a_kernel_f32 if low_precision else _implicit_a_kernel

    x2d = x.reshape(rows, hw)
    # Per-row bias column: row n*C + c gets implicit[0, c, 0, 0] (matches NCHW flatten).
    bias = jnp.broadcast_to(
        implicit.reshape(1, C).astype(bias_dtype), (N, C)
    ).reshape(rows, 1)

    target_block_bytes, vmem_limit = _block_budget()

    # ---- tile selection (no divisor constraint; ragged edges masked by Pallas) -------
    # Lane tile: cover the full width (rounded up to 128) so each block's DMA is one
    # fully contiguous chunk; only clip when a single sub-row slab would blow the budget.
    tile_hw_cap = max(128, (target_block_bytes // (sub * dbytes)) // 128 * 128)
    tile_hw = min(_round_up(hw, 128), tile_hw_cap)

    # Row tile: as many sublane-aligned rows as fit the budget at that width.
    # Cap at 2048: the (tile_rows, 1) bias block lane-pads to 128 in VMEM, so its
    # double-buffered cost is 2*tile_rows*128*dbytes -- keep it small.
    rows_aligned = _round_up(rows, sub)
    tile_rows = (target_block_bytes // (tile_hw * dbytes)) // sub * sub
    tile_rows = max(sub, min(tile_rows, rows_aligned, 2048))

    # Prefer an even number (>= 2) of row grid steps so v7x's two TensorCores get a
    # balanced split of the "parallel" axis (harmless on single-core chips).
    row_steps = pl.cdiv(rows, tile_rows)
    if row_steps > 1 and row_steps % 2 == 1:
        cand = max(sub, min(_round_up(pl.cdiv(rows, row_steps + 1), sub), 2048))
        if pl.cdiv(rows, cand) % 2 == 0:
            tile_rows = cand

    grid = (pl.cdiv(rows, tile_rows), pl.cdiv(hw, tile_hw))

    extra = {}
    if donate_x:
        # Same shape/dtype now that there is no padding; caller must not reuse x.
        extra["input_output_aliases"] = {1: 0}

    out2d = pl.pallas_call(
        kernel,
        out_shape=jax.ShapeDtypeStruct((rows, hw), dtype),
        grid=grid,
        in_specs=[
            # Bias: block index only depends on i -> DMA'd once per row tile and kept
            # resident across the inner (lane) grid axis.
            pl.BlockSpec((tile_rows, 1), lambda i, j: (i, 0)),
            pl.BlockSpec((tile_rows, tile_hw), lambda i, j: (i, j)),
        ],
        out_specs=pl.BlockSpec((tile_rows, tile_hw), lambda i, j: (i, j)),
        compiler_params=pltpu.CompilerParams(
            dimension_semantics=("parallel", "parallel"),
            vmem_limit_bytes=vmem_limit,
        ),
        **extra,
    )(bias, x2d)

    return out2d.reshape(N, C, H, W)


if __name__ == "__main__":
    # Module config: ImplicitA(channel=4, mean=0.0, std=0.02)
    N, C, H, W = 2, 4, 16, 16
    mean, std = 0.0, 0.02

    key = jax.random.PRNGKey(0)
    k_param, k_x = jax.random.split(key)

    # Deterministic parameter init: normal(mean, std), shape (1, C, 1, 1)
    implicit = mean + std * jax.random.normal(k_param, (1, C, 1, 1), dtype=jnp.float32)
    x = jax.random.normal(k_x, (N, C, H, W), dtype=jnp.float32)

    # Force the Pallas path (test shape is tiny; auto-dispatch would use fused XLA add).
    out = implicit_a(x, implicit, use_pallas=True)
    out = jax.block_until_ready(out)

    # Reference check (plain JAX broadcast add).
    ref = implicit + x
    assert out.shape == (N, C, H, W)
    assert jnp.allclose(out, ref, atol=1e-6, rtol=1e-6)

    print("KERNEL_OK")
</pallas_src>

<mosaic_0001>
module attributes {stable_mosaic.version = 11 : i64} {
  func.func @_implicit_a_kernel(%arg0: i32, %arg1: i32, %arg2: memref<8x1xf32, #tpu.memory_space<vmem>>, %arg3: memref<8x256xf32, #tpu.memory_space<vmem>>, %arg4: memref<8x256xf32, #tpu.memory_space<vmem>>) attributes {dimension_semantics = [#tpu.dimension_semantics<parallel>, #tpu.dimension_semantics<parallel>], iteration_bounds = array<i64: 1, 1>, scalar_prefetch = 0 : i64, scratch_operands = 0 : i64, tpu.core_type = #tpu.core_type<tc>, window_params = [{transform_indices = @transform_0, window_bounds = array<i64: 8, 1>}, {transform_indices = @transform_1, window_bounds = array<i64: 8, 256>}, {transform_indices = @transform_2, window_bounds = array<i64: 8, 256>}]} {
    %c0 = arith.constant 0 : index
    %c0_0 = arith.constant 0 : index
    %0 = vector.load %arg3[%c0, %c0_0] : memref<8x256xf32, #tpu.memory_space<vmem>>, vector<8x256xf32>
    %c0_1 = arith.constant 0 : index
    %c0_2 = arith.constant 0 : index
    %1 = vector.load %arg2[%c0_1, %c0_2] : memref<8x1xf32, #tpu.memory_space<vmem>>, vector<8x1xf32>
    %2 = vector.broadcast %1 : vector<8x1xf32> to vector<8x256xf32>
    %3 = arith.addf %0, %2 : vector<8x256xf32>
    %c0_3 = arith.constant 0 : index
    %c0_4 = arith.constant 0 : index
    %4 = vector.load %arg4[%c0_3, %c0_4] : memref<8x256xf32, #tpu.memory_space<vmem>>, vector<8x256xf32>
    tpu.vector_store %arg4[%c0_3, %c0_4], %3 {strides = array<i32>} : memref<8x256xf32, #tpu.memory_space<vmem>>, vector<8x256xf32>,
    return
  }
  func.func @transform_0(%arg0: i32, %arg1: i32) -> (i32, i32) {
    %c0_i32 = arith.constant 0 : i32
    %c0_i32_0 = arith.constant 0 : i32
    return %arg0, %c0_i32 : i32, i32
  }
  func.func @transform_1(%arg0: i32, %arg1: i32) -> (i32, i32) {
    %c0_i32 = arith.constant 0 : i32
    return %arg0, %arg1 : i32, i32
  }
  func.func @transform_2(%arg0: i32, %arg1: i32) -> (i32, i32) {
    %c0_i32 = arith.constant 0 : i32
    return %arg0, %arg1 : i32, i32
  }
}

</mosaic_0001>

<bundles_post_ra>
// kernel: tpu_custom_call.1
= control target key start
LH: loop header
LB: loop body
LE: loop exit
PB: predicated region body
PF: predicated region fallthrough
CT: control target
= control target key end

     0   :  { %7 = vsyncpa [#allocation3], 0  ;;  %s126_s0 = inlined_call_operand.vmem [shape: f32[8,1], index: 0, kind: input, shape index: {}]   ;;  %s127_s1 = inlined_call_operand.hbm [shape: f32[8,256], index: 1, kind: input, shape index: {}]   ;;  %s128_s2 = inlined_call_operand.hbm [shape: f32[8,256], index: 2, kind: output, shape index: {}]  }
   0x1   :  { %8 = vsyncpa [#allocation4], 0  ;;  %s99_s9 = smov [#allocation2]  }
   0x2   :  { %s17_s10 = sshll.u32 %s99_s9, 4  ;;  %s18_s10 = int_to_ptr.vmem [resolvable:$true] %s17_s10 }
   0x3   :  { %s63_s11 = scalar_lea.vmem %s18_s10, 256  ;;  %p68_p1 = scmp.lt.s32.totalorder %s18_s10, %s18_s10 }
   0x4   :  { %p64_p0 = scmp.ne.s32.totalorder %s18_s10, %s63_s11  ;;  %p69_p2 = scmp.lt.s32.totalorder %s63_s11, %s63_s11 }
   0x6   :  { %p70_p3 = por %p69_p2, %p68_p1 }
   0x8   :  { %p71_p4 = pnand %p70_p3, %p64_p0 }
   0xa   :  { %74 = shalt.err (!%p71_p4)
}
   0xb   :  { %20 = dma.hbm_to_vmem [thread:$0]  %s127_s1, 256, %s18_s10, [#allocation3]  }
   0xc   :  { %95 = dma.done.wait [#allocation3], 256  }
   0xd   :  { %96 = vsyncadd [#allocation3], 4294967040  ;;  %v100_v0 = vmov 0   ;;  %v26_v1 = vld [vmem:[%s126_s0] sm:$0xff]  ;;  %v25_v3 = vld [vmem:[#allocation2 + $0x8] sm:$0xff]  ;;  %s101_s16 = smov [#allocation5]  }
   0xe   :  { %54 = vset.pattern.permute.xlu0 %v100_v0  ;;  %v24_v2 = vld [vmem:[#allocation2] sm:$0xff]  ;;  %s42_s17 = sshll.u32 %s101_s16, 4  ;;  %s43_s17 = int_to_ptr.vmem [resolvable:$true] %s42_s17 }
   0xf   :  { %29 = vperm.xlu0 %54, %v26_v1   ;;  %s75_s1 = scalar_lea.vmem %s43_s17, 256  ;;  %p80_p6 = scmp.lt.s32.totalorder %s43_s17, %s43_s17 }
  0x10   :  { %p76_p5 = scmp.ne.s32.totalorder %s43_s17, %s75_s1  ;;  %p81_p7 = scmp.lt.s32.totalorder %s75_s1, %s75_s1 }
  0x12   :  { %p82_p8 = por %p81_p7, %p80_p6 }
  0x14   :  { %p83_p9 = pnand %p82_p8, %p76_p5 }
  0x8a   :  { %v30_v4 = vpop.permute.xlu0 %29 }
  0x8b   :  { %v32_v5 = vadd.f32 %v30_v4, %v24_v2  ;;  %v33_v6 = vadd.f32 %v30_v4, %v25_v3 }
  0x8d   :  { %34 = vst [vmem:[#allocation5] sm:$0xff] %v32_v5  ;;  %35 = vst [vmem:[#allocation5 + $0x8] sm:$0xff] %v33_v6 }
  0x8e   :  { %86 = shalt.err (!%p83_p9)
}
  0x8f   :  { %45 = dma.vmem_to_hbm [thread:$0]  %s43_s17, 256, %s128_s2, [#allocation4]  }
  0x90   :  { %97 = dma.done.wait [#allocation4], 256  }
  0x91   :  { %98 = vsyncadd [#allocation4], 4294967040 }
  0x92   :  { %49 = vsyncpa [#allocation3], 1 }
  0x93   :  { %50 = vsyncpa [#allocation4], 1 }

</bundles_post_ra>
